<compile_context>
chip_gen: v7x
topology: tpu7x:2x2x1
jax: 0.10.0
libtpu: 0.0.40
codegen_flags: <defaults>
</compile_context>

<pallas_src>
import jax
import jax.numpy as jnp
from jax.experimental import pallas as pl
from jax.experimental.pallas import tpu as pltpu

# ----------------------------- config (small, consistent with module) --------
IN_CHANNELS = 4
MID_CHANNELS = 8
OUT_CHANNELS = 4
BATCH = 2
H = 16
W = 16
PATH_DEPTH = 2
PHASE_RES_DEG = 2      # phase_res=2 (degree-mode DeviceQuantizer)
IN_BIT = 16            # in_bit=16 (ActQuantizer_LSQ)

_QP = float(2.0 ** (IN_BIT - 1) - 1)        # 32767
_QN = float(-(2.0 ** (IN_BIT - 1)))         # -32768


# ----------------------------- fused forward kernel --------------------------
def meta_forward_kernel(qp_ref, w_ref, b_ref, x_ref, o_ref):
    """LSQ fake-quant + block-diagonal channel mix + bias, on (N*C, H*W) slabs.

    x_ref/o_ref: (N*Cin, HW) / (N*Cout, HW) = (8, 256) — exact (8,128)-tile multiples,
    so all vector loads and the single output store are fully dense and unmasked.
    qp_ref (SMEM, (3,)): [scale, 1/scale, offset].  w_ref (8,8) is kron(I_N, W_fused^T);
    the channel mix is a single MXU matmul (no sublane shuffles).
    """
    s = qp_ref[0]
    inv_s = qp_ref[1]
    beta = qp_ref[2]

    # LSQ fake quantization (tensor-wise learned scale + offset).
    x = x_ref[...]                                               # (8, 256)
    xq = jnp.clip(jnp.round((x - beta) * inv_s), _QN, _QP) * s + beta

    # Fused channel mix: one (8,8)@(8,256) matmul + per-row bias (lane broadcast).
    y = jnp.dot(w_ref[...], xq, preferred_element_type=jnp.float32)
    o_ref[...] = y + b_ref[...]                                  # (8,1) bcast over lanes


def meta_layer_forward(x_nchw, params):
    """x_nchw: (N, Cin, H, W) float32 -> (N, Cout, H, W) float32."""
    n, c_in, h, w = x_nchw.shape
    assert c_in == IN_CHANNELS
    hw = h * w
    rows_in = n * c_in
    rows_out = n * OUT_CHANNELS

    # Free reshape (channels and spatial are adjacent in NCHW): fully packed vregs.
    x2d = x_nchw.reshape(rows_in, hw)

    # `_weight` property: phase quantizer (round to multiples of phase_res degrees),
    # mag quantizer (identity), metasurface modulation mod = mag*cos(phase_q).
    # 8 elements -> plain JAX; XLA constant-folds / fuses this.
    step = jnp.float32(PHASE_RES_DEG) * jnp.pi / 180.0
    phase_q = jnp.round(params["weight_phase"] / step) * step
    mod = params["weight_mag"] * jnp.cos(phase_q)                 # (1, MID)
    # TODO(synk): DeviceQuantizer may re-wrap phase into (-pi, pi]; cos() is invariant.

    # Algebraic fusion: ((x @ apre) * mod) @ apost == x @ ((apre * mod) @ apost)
    w_fused = (params["alpha_pre"] * mod) @ params["alpha_post"]  # (Cin, Cout) = (4, 4)

    # Block-diagonal form so the per-batch channel mix is one matmul over rows.
    w_blk = jnp.kron(jnp.eye(n, dtype=jnp.float32), w_fused.T)    # (rows_out, rows_in)
    bias_rows = jnp.tile(params["bias"], n).reshape(rows_out, 1)  # (rows_out, 1)

    scale = params["quant_scale"][0]
    qparams = jnp.stack([scale, 1.0 / scale, params["quant_offset"][0]])  # (3,)

    # add_input_noise / add_detection_noise are no-ops at default snr = 0.
    out2d = pl.pallas_call(
        meta_forward_kernel,
        out_shape=jax.ShapeDtypeStruct((rows_out, hw), jnp.float32),
        in_specs=[
            pl.BlockSpec(memory_space=pltpu.MemorySpace.SMEM),    # LSQ [s, 1/s, beta]
            pl.BlockSpec(memory_space=pltpu.MemorySpace.VMEM),    # W_blk (8, 8)
            pl.BlockSpec(memory_space=pltpu.MemorySpace.VMEM),    # bias rows (8, 1)
            pl.BlockSpec(memory_space=pltpu.MemorySpace.VMEM),    # x slab (8, 256)
        ],
        out_specs=pl.BlockSpec(memory_space=pltpu.MemorySpace.VMEM),
    )(qparams, w_blk, bias_rows, x2d)

    return out2d.reshape(n, OUT_CHANNELS, h, w)


# ----------------------------- deterministic parameter init ------------------
def init_params(key):
    k1, k2, k3, k4 = jax.random.split(key, 4)
    # reset_parameters: weight ~ U(-pi, pi) (stored as phase), mag = |w|
    weight_phase = jax.random.uniform(
        k1, (1, MID_CHANNELS), jnp.float32, -jnp.pi, jnp.pi)
    weight_mag = jax.random.uniform(
        k2, (1, MID_CHANNELS), jnp.float32, 0.5, 1.5)
    # alpha_pre <- Conv2d(in, mid, 1) default init (uniform +- 1/sqrt(fan_in))
    bound_pre = 1.0 / jnp.sqrt(IN_CHANNELS)
    alpha_pre = jax.random.uniform(
        k3, (IN_CHANNELS, MID_CHANNELS), jnp.float32, -bound_pre, bound_pre)
    # alpha_post <- Conv2d(mid, out, 1) default init, scaled by 1.2**path_depth
    bound_post = 1.0 / jnp.sqrt(MID_CHANNELS)
    alpha_post = jax.random.uniform(
        k4, (MID_CHANNELS, OUT_CHANNELS), jnp.float32, -bound_post, bound_post)
    alpha_post = alpha_post * (1.2 ** PATH_DEPTH)
    # bias ~ U(0, 0) = zeros
    bias = jnp.zeros((OUT_CHANNELS,), jnp.float32)
    # ActQuantizer_LSQ: scale/offset are learned (tensor-wise) parameters.
    # Deterministic init: scale = 2*E|x|/sqrt(Qp) assuming unit-normal input, offset = 0.
    quant_scale = jnp.asarray([2.0 * 0.7978845608 / (_QP ** 0.5)], jnp.float32)
    quant_offset = jnp.zeros((1,), jnp.float32)
    return {
        "weight_phase": weight_phase,
        "weight_mag": weight_mag,
        "alpha_pre": alpha_pre,
        "alpha_post": alpha_post,
        "bias": bias,
        "quant_scale": quant_scale,
        "quant_offset": quant_offset,
    }


if __name__ == "__main__":
    key = jax.random.PRNGKey(0)
    kx, kp = jax.random.split(key)
    x = jax.random.normal(kx, (BATCH, IN_CHANNELS, H, W), jnp.float32)
    params = init_params(kp)

    out = jax.block_until_ready(meta_layer_forward(x, params))
    assert out.shape == (BATCH, OUT_CHANNELS, H, W)
    assert bool(jnp.all(jnp.isfinite(out)))
    print("KERNEL_OK")
</pallas_src>

<mosaic_0001>
module attributes {stable_mosaic.version = 11 : i64} {
  func.func @meta_forward_kernel(%arg0: memref<3xf32, #tpu.memory_space<smem>>, %arg1: memref<8x8xf32, #tpu.memory_space<vmem>>, %arg2: memref<8x1xf32, #tpu.memory_space<vmem>>, %arg3: memref<8x256xf32, #tpu.memory_space<vmem>>, %arg4: memref<8x256xf32, #tpu.memory_space<vmem>>) attributes {dimension_semantics = [], scalar_prefetch = 0 : i64, scratch_operands = 0 : i64, tpu.core_type = #tpu.core_type<tc>} {
    %c0 = arith.constant 0 : index
    %0 = memref.load %arg0[%c0] : memref<3xf32, #tpu.memory_space<smem>>
    %c1 = arith.constant 1 : index
    %1 = memref.load %arg0[%c1] : memref<3xf32, #tpu.memory_space<smem>>
    %c2 = arith.constant 2 : index
    %2 = memref.load %arg0[%c2] : memref<3xf32, #tpu.memory_space<smem>>
    %c0_0 = arith.constant 0 : index
    %c0_1 = arith.constant 0 : index
    %3 = vector.load %arg3[%c0_0, %c0_1] : memref<8x256xf32, #tpu.memory_space<vmem>>, vector<8x256xf32>
    %4 = vector.broadcast %2 : f32 to vector<8x256xf32>
    %5 = arith.subf %3, %4 : vector<8x256xf32>
    %6 = vector.broadcast %1 : f32 to vector<8x256xf32>
    %7 = arith.mulf %5, %6 : vector<8x256xf32>
    %8 = math.roundeven %7 : vector<8x256xf32>
    %cst = arith.constant -3.276800e+04 : f32
    %cst_2 = arith.constant 3.276700e+04 : f32
    %9 = vector.broadcast %cst : f32 to vector<8x256xf32>
    %10 = arith.maximumf %9, %8 : vector<8x256xf32>
    %11 = vector.broadcast %cst_2 : f32 to vector<8x256xf32>
    %12 = arith.minimumf %11, %10 : vector<8x256xf32>
    %13 = vector.broadcast %0 : f32 to vector<8x256xf32>
    %14 = arith.mulf %12, %13 : vector<8x256xf32>
    %15 = vector.broadcast %2 : f32 to vector<8x256xf32>
    %16 = arith.addf %14, %15 : vector<8x256xf32>
    %c0_3 = arith.constant 0 : index
    %c0_4 = arith.constant 0 : index
    %17 = vector.load %arg1[%c0_3, %c0_4] : memref<8x8xf32, #tpu.memory_space<vmem>>, vector<8x8xf32>
    %cst_5 = arith.constant dense<0.000000e+00> : vector<8x256xf32>
    %18 = tpu.matmul %17, %16, %cst_5 {dimension_numbers = #tpu.dot_dimension_numbers<[1], [0], [0], [1], [0, 0, 1, 1], [], []>} : vector<8x8xf32>, vector<8x256xf32>, vector<8x256xf32> -> vector<8x256xf32>
    %c0_6 = arith.constant 0 : index
    %c0_7 = arith.constant 0 : index
    %19 = vector.load %arg2[%c0_6, %c0_7] : memref<8x1xf32, #tpu.memory_space<vmem>>, vector<8x1xf32>
    %20 = vector.broadcast %19 : vector<8x1xf32> to vector<8x256xf32>
    %21 = arith.addf %18, %20 : vector<8x256xf32>
    %c0_8 = arith.constant 0 : index
    %c0_9 = arith.constant 0 : index
    %22 = vector.load %arg4[%c0_8, %c0_9] : memref<8x256xf32, #tpu.memory_space<vmem>>, vector<8x256xf32>
    tpu.vector_store %arg4[%c0_8, %c0_9], %21 {strides = array<i32>} : memref<8x256xf32, #tpu.memory_space<vmem>>, vector<8x256xf32>,
    return
  }
}

</mosaic_0001>

<bundles_post_ra>
// kernel: tpu_custom_call.1
= control target key start
LH: loop header
LB: loop body
LE: loop exit
PB: predicated region body
PF: predicated region fallthrough
CT: control target
= control target key end

     0   :  { %9 = vsyncpa [#allocation5], 0  ;;  %s304_s0 = inlined_call_operand.vmem [shape: f32[3], index: 0, kind: input, shape index: {}]   ;;  %s305_s1 = inlined_call_operand.hbm [shape: f32[8,8], index: 1, kind: input, shape index: {}]   ;;  %s306_s2 = inlined_call_operand.vmem [shape: f32[8,1], index: 2, kind: input, shape index: {}]   ;;  %s307_s3 = inlined_call_operand.vmem [shape: f32[8,256], index: 3, kind: input, shape index: {}]   ;;  %s308_s4 = inlined_call_operand.hbm [shape: f32[8,256], index: 4, kind: output, shape index: {}]  }
   0x1   :  { %10 = vsyncpa [#allocation3], 0 }
   0x2   :  { %11 = vsyncpa [#allocation4], 0  ;;  %s18_s17 = sshll.u32 %s304_s0, 4  ;;  %s19_s17 = int_to_ptr.vmem [resolvable:$true] %s18_s17 }
   0x3   :  { %s176_s18 = scalar_lea.vmem %s19_s17, 16  ;;  %p181_p1 = scmp.lt.s32.totalorder %s19_s17, %s19_s17 }
   0x4   :  { %p177_p0 = scmp.ne.s32.totalorder %s19_s17, %s176_s18  ;;  %p182_p2 = scmp.lt.s32.totalorder %s176_s18, %s176_s18 }
   0x6   :  { %p183_p3 = por %p182_p2, %p181_p1 }
   0x8   :  { %p184_p4 = pnand %p183_p3, %p177_p0 }
   0xa   :  { %187 = shalt.err (!%p184_p4)
}
   0xb   :  { %s238_s19 = smov [#allocation2]   ;;  %s239_s20 = smov [#allocation6]  }
   0xc   :  { %21 = dma.vmem_to_smem %s19_s17, 16, %s238_s19, [#allocation5]  }
   0xd   :  { %s28_s21 = sshll.u32 %s239_s20, 4  ;;  %s188_s24 = scalar_lea.hbm %s305_s1, 128  ;;  %s29_s21 = int_to_ptr.vmem [resolvable:$true] %s28_s21 }
   0xe   :  { %p189_p5 = scmp.ne.s32.totalorder %s305_s1, %s188_s24  ;;  %p192_p6 = scmp.lt.u32.totalorder %s188_s24, %s305_s1 }
  0x10   :  { %p194_p7 = pnand %p192_p6, %p189_p5 }
  0x12   :  { %197 = shalt.err (!%p194_p7)
}
  0x13   :  { %s198_s28 = scalar_lea.vmem %s29_s21, 128  ;;  %p203_p9 = scmp.lt.s32.totalorder %s29_s21, %s29_s21 }
  0x14   :  { %p199_p8 = scmp.ne.s32.totalorder %s29_s21, %s198_s28  ;;  %p204_p10 = scmp.lt.s32.totalorder %s198_s28, %s198_s28 }
  0x16   :  { %p205_p11 = por %p204_p10, %p203_p9 }
  0x18   :  { %p206_p12 = pnand %p205_p11, %p199_p8 }
  0x1a   :  { %209 = shalt.err (!%p206_p12)
}
  0x1b   :  { %31 = dma.hbm_to_vmem [thread:$0]  %s305_s1, 128, %s29_s21, [#allocation3]  }
  0x1c   :  { %232 = dma.done.wait [#allocation5], 16  }
  0x1d   :  { %233 = vsyncadd [#allocation5], 4294967280 }
  0x1e   :  { %234 = dma.done.wait [#allocation3], 128  }
  0x1f   :  { %235 = vsyncadd [#allocation3], 4294967168 }
  0x20   :  { %42 = sfence }
  0x21   :  { %s165_s5 = sld [smem:[#allocation2 + $0x1]]  ;;  %s166_s6 = sld [smem:[#allocation2 + $0x2]]  ;;  %v240_v0 = vmov 0.0   ;;  %v241_v1 = vmov 0   ;;  %v66_v2 = vld [vmem:[%s306_s2] sm:$0xff]  ;;  %v47_v4 = vld [vmem:[%s307_s3 + $0x8] sm:$0xff] }
  0x22   :  { %140 = vmatprep.mubr.f32.mxu0 %v240_v0  ;;  %175 = vset.pattern.permute.xlu0 %v241_v1  ;;  %v46_v3 = vld [vmem:[%s307_s3] sm:$0xff]  ;;  %s43_s12 = sld [smem:[#allocation2]]  ;;  %vm72_vm0 = vcmask 64512   ;;  %s242_s2 = smov [#allocation7]  }
  0x23   :  { %69 = vperm.xlu0 %175, %v66_v2   ;;  %v65_v22 = vld [vmem:[#allocation6] sm:$0xff]  ;;  %s155_s3 = sshll.u32 %s242_s2, 4  ;;  %s156_s3 = int_to_ptr.vmem [resolvable:$true] %s155_s3 }
  0x24   :  { %s210_s13 = scalar_lea.vmem %s156_s3, 256  ;;  %p215_p0 = scmp.lt.s32.totalorder %s156_s3, %s156_s3 }
  0x25   :  { %p211_p13 = scmp.ne.s32.totalorder %s156_s3, %s210_s13  ;;  %p216_p1 = scmp.lt.s32.totalorder %s210_s13, %s210_s13 }
  0x27   :  { %v48_v5 = vstv %s166_s6  ;;  %v51_v6 = vstv %s165_s5  ;;  %p217_p2 = por %p216_p1, %p215_p0 }
  0x28   :  { %v49_v7 = vsub.f32 %v46_v3, %v48_v5  ;;  %v50_v8 = vsub.f32 %v47_v4, %v48_v5  ;;  %v60_v15 = vstv %s43_s12 }
  0x29   :  { %p218_p3 = pnand %p217_p2, %p211_p13 }
  0x2a   :  { %v53_v9 = vmul.f32 %v51_v6, %v50_v8  ;;  %v52_v10 = vmul.f32 %v51_v6, %v49_v7 }
  0x2c   :  { %v169_v11 = vround.rtne.f32 %v53_v9  ;;  %v168_v12 = vround.rtne.f32 %v52_v10 }
  0x2e   :  { %v57_v13 = vmax.f32 %v169_v11, -32768.0  ;;  %v56_v14 = vmax.f32 %v168_v12, -32768.0 }
  0x30   :  { %v59_v16 = vmin.f32 %v57_v13, 32767.0  ;;  %v58_v17 = vmin.f32 %v56_v14, 32767.0 }
  0x32   :  { %v62_v18 = vmul.f32 %v60_v15, %v59_v16  ;;  %v61_v19 = vmul.f32 %v60_v15, %v58_v17 }
  0x34   :  { %v64_v20 = vadd.f32 %v62_v18, %v48_v5  ;;  %v63_v21 = vadd.f32 %v61_v19, %v48_v5 }
  0x36   :  { %76 = vmatprep.subr.mxu0 %v64_v20 }
  0x37   :  { %77 = vmatpush1.msra.mxu0 %v63_v21 }
  0x38   :  { %167 = vmatmul.mubr.msk.f32.vlgmr.msra.gmra.mrb[0].mxu0 %vm72_vm0, %v65_v22 }
  0xa2   :  { %v70_v23 = vpop.permute.xlu0 %69 }
 0x10b   :  { %v142_v24 = vpop.f32.mrb[0].mxu0 }
 0x10c   :  { %v143_v25 = vadd.f32 %v142_v24, %v70_v23  ;;  %v144_v26 = vpop.f32.mrb[1].mxu0 }
 0x10d   :  { %v145_v27 = vadd.f32 %v144_v26, %v70_v23 }
 0x10e   :  { %147 = vst [vmem:[#allocation7] sm:$0xff] %v143_v25 }
 0x10f   :  { %148 = vst [vmem:[#allocation7 + $0x8] sm:$0xff] %v145_v27 }
 0x110   :  { %221 = shalt.err (!%p218_p3)
}
 0x111   :  { %s222_s16 = scalar_lea.hbm %s308_s4, 256 }
 0x112   :  { %p223_p4 = scmp.ne.s32.totalorder %s308_s4, %s222_s16  ;;  %p226_p5 = scmp.lt.u32.totalorder %s222_s16, %s308_s4 }
 0x114   :  { %p228_p6 = pnand %p226_p5, %p223_p4 }
 0x116   :  { %231 = shalt.err (!%p228_p6)
}
 0x117   :  { %158 = dma.vmem_to_hbm [thread:$0]  %s156_s3, 256, %s308_s4, [#allocation4]  }
 0x118   :  { %236 = dma.done.wait [#allocation4], 256  }
 0x119   :  { %237 = vsyncadd [#allocation4], 4294967040 }
 0x11a   :  { %162 = vsyncpa [#allocation3], 1 }
 0x11b   :  { %163 = vsyncpa [#allocation4], 1 }
 0x11c   :  { %164 = vsyncpa [#allocation5], 1 }

</bundles_post_ra>
